<compile_context>
chip_gen: v6e
topology: v6e:2x2x1
jax: 0.10.0
libtpu: 0.0.40
codegen_flags: <defaults>
</compile_context>

<pallas_src>
import jax
import jax.numpy as jnp
from jax.experimental import pallas as pl
from jax.experimental.pallas import tpu as pltpu

_LANE = 128


def _round_up(x, m):
    return (x + m - 1) // m * m


def _triplet_head_kernel(h_ref, t_ref, c_ref, w1_ref, b1_ref, w2_ref, b2_ref, o_ref):
    # Split-accumulate == concat([h, t, c], axis=1) @ W1, without the XLU
    # relayout a lane-axis concat would force.  bf16 operands, f32 MXU acc.
    acc = jnp.dot(h_ref[...], w1_ref[0], preferred_element_type=jnp.float32)
    acc += jnp.dot(t_ref[...], w1_ref[1], preferred_element_type=jnp.float32)
    acc += jnp.dot(c_ref[...], w1_ref[2], preferred_element_type=jnp.float32)
    # dense_head_tail_ctxt bias + tanh.  f32 tanh is the portable default
    # (v5e EUP has no bf16 path); the result feeds the MXU in bf16.
    hidden = jnp.tanh(acc + b1_ref[...]).astype(w2_ref.dtype)
    # out_proj: bf16 x bf16 with f32 accumulation; padded lanes stay exactly 0.
    out = jnp.dot(hidden, w2_ref[...], preferred_element_type=jnp.float32) + b2_ref[...]
    o_ref[...] = out.astype(o_ref.dtype)


def prepare_triplet_head_params(w1, b1, w2, b2, compute_dtype=jnp.bfloat16):
    """Pad / reshape / cast the parameters ONCE (hoisted out of the call path).

    w1: [3*D, inner]  b1: [inner]  w2: [inner, C]  b2: [C]
    (weights stored as [in_features, out_features])
    """
    three_d, inner = w1.shape
    assert three_d % 3 == 0, "w1 must have 3*D rows"
    D = three_d // 3
    inner2, C = w2.shape
    assert inner2 == inner

    inner_p = _round_up(inner, _LANE)
    c_p = _round_up(C, _LANE)

    # Zero padding keeps the numerics exact: padded W1 cols & b1 entries are 0,
    # tanh(0)=0, padded W2 rows are 0, padded W2 cols & b2 entries are 0.
    w1_p = jnp.pad(w1, ((0, 0), (0, inner_p - inner))) \
              .reshape(3, D, inner_p).astype(compute_dtype)
    b1_p = jnp.pad(b1, (0, inner_p - inner)).reshape(1, inner_p).astype(jnp.float32)
    w2_p = jnp.pad(w2, ((0, inner_p - inner), (0, c_p - C))).astype(compute_dtype)
    b2_p = jnp.pad(b2, (0, c_p - C)).reshape(1, c_p).astype(jnp.float32)

    return dict(w1=w1_p, b1=b1_p, w2=w2_p, b2=b2_p,
                D=D, inner=inner, C=C, inner_p=inner_p, c_p=c_p,
                compute_dtype=jnp.dtype(compute_dtype))


def bart_triplet_head(head_states, tail_states, context_states, params,
                      *, batch_tile=None, return_padded=False):
    """Pallas implementation of BartTripletHead.forward (eval mode).

    head/tail/context_states: [B, D];  returns [B, num_classes]
    (or the lane-padded [B_pad, c_p] slab if return_padded=True, so a consumer
    can fuse the slice instead of paying an extra HBM copy).
    """
    B, D = head_states.shape
    assert D == params["D"]
    out_dtype = head_states.dtype
    cd = params["compute_dtype"]
    inner_p, c_p, C = params["inner_p"], params["c_p"], params["C"]

    # 16-bit activations pack 16 rows per sublane group; f32 packs 8.
    sublane = 16 if cd.itemsize == 2 else 8

    # ---- VMEM accounting (bytes) -------------------------------------------
    w_bytes = cd.itemsize
    weight_vmem = (3 * D * inner_p + inner_p * c_p) * w_bytes \
        + (inner_p + c_p) * 4                      # single-buffered (Buffered(1))

    def act_vmem(tile):                            # double-buffered activation tiles
        return 2 * (3 * tile * _round_up(D, _LANE) * w_bytes
                    + tile * c_p * jnp.dtype(out_dtype).itemsize)

    # ---- batch tile: target <=512 rows, pad B up to a multiple of it --------
    if batch_tile is None:
        # 40 MiB activation+weight budget leaves >20 MiB headroom on v7x's
        # 64 MiB physical VMEM; the cap could be raised to 1024 on v5e/v6e
        # (128 MiB VMEM) but 512 is the portable default.
        budget = 40 << 20
        batch_tile = min(512, _round_up(B, sublane))
        while batch_tile > sublane and weight_vmem + act_vmem(batch_tile) > budget:
            batch_tile = max(sublane, _round_up(batch_tile // 2, sublane))
        # Prefer >=2 grid steps so v7x's second TensorCore has work.
        if B > sublane and _round_up(B, batch_tile) // batch_tile < 2:
            batch_tile = max(sublane, _round_up(pl.cdiv(B, 2), sublane))
    assert batch_tile % sublane == 0, "batch_tile must be a multiple of the sublane pack"

    B_p = _round_up(B, batch_tile)
    if B_p != B:  # pad rows (one extra tile of work at most); sliced off below
        row_pad = ((0, B_p - B), (0, 0))
        head_states = jnp.pad(head_states, row_pad)
        tail_states = jnp.pad(tail_states, row_pad)
        context_states = jnp.pad(context_states, row_pad)
    head_states = head_states.astype(cd)
    tail_states = tail_states.astype(cd)
    context_states = context_states.astype(cd)

    grid = (B_p // batch_tile,)

    # Explicit scoped-VMEM limit derived from the actual block sizes
    # (v5e's default scoped limit is only 16 MiB and would not hold the slab).
    vmem_limit = int(min(100 << 20,
                         max(32 << 20, weight_vmem + act_vmem(batch_tile) + (8 << 20))))

    tile_map = lambda i: (i, 0)
    const_map2 = lambda i: (0, 0)
    const_map3 = lambda i: (0, 0, 0)

    out_padded = pl.pallas_call(
        _triplet_head_kernel,
        out_shape=jax.ShapeDtypeStruct((B_p, c_p), out_dtype),
        grid_spec=pltpu.PrefetchScalarGridSpec(
            num_scalar_prefetch=0,
            grid=grid,
            in_specs=[
                pl.BlockSpec((batch_tile, D), tile_map),             # head
                pl.BlockSpec((batch_tile, D), tile_map),             # tail
                pl.BlockSpec((batch_tile, D), tile_map),             # context
                # Grid-invariant operands: single-buffered (no re-DMA, half the VMEM).
                pl.BlockSpec((3, D, inner_p), const_map3,
                             pipeline_mode=pl.Buffered(1)),          # W1 (split)
                pl.BlockSpec((1, inner_p), const_map2,
                             pipeline_mode=pl.Buffered(1)),          # b1
                pl.BlockSpec((inner_p, c_p), const_map2,
                             pipeline_mode=pl.Buffered(1)),          # W2
                pl.BlockSpec((1, c_p), const_map2,
                             pipeline_mode=pl.Buffered(1)),          # b2
            ],
            out_specs=pl.BlockSpec((batch_tile, c_p), tile_map),
        ),
        compiler_params=pltpu.CompilerParams(
            # batch axis is embarrassingly parallel -> megacore shards it on v7x
            dimension_semantics=("parallel",),
            vmem_limit_bytes=vmem_limit,
        ),
    )(head_states, tail_states, context_states,
      params["w1"], params["b1"], params["w2"], params["b2"])

    if return_padded:
        return out_padded
    return out_padded[:B, :C]


def _reference(head, tail, ctxt, w1, b1, w2, b2):
    x = jnp.concatenate([head, tail, ctxt], axis=1)
    h = jnp.tanh(x @ w1 + b1)
    return h @ w2 + b2


if __name__ == "__main__":
    # Small shapes consistent with the module (eval mode; dropout is a no-op).
    B = 32            # batch; batch_tile=16 -> grid=(2,) exercises the pipeline
    input_dim = 32    # per-state hidden size (head/tail/context each)
    inner_dim = 64
    num_classes = 8

    key = jax.random.PRNGKey(0)
    k_h, k_t, k_c, k_w1, k_b1, k_w2, k_b2 = jax.random.split(key, 7)

    head = jax.random.normal(k_h, (B, input_dim), dtype=jnp.float32)
    tail = jax.random.normal(k_t, (B, input_dim), dtype=jnp.float32)
    ctxt = jax.random.normal(k_c, (B, input_dim), dtype=jnp.float32)

    # Deterministic synthetic parameters (Linear-like fan-in scaling),
    # stored as [in_features, out_features].
    w1 = jax.random.normal(k_w1, (3 * input_dim, inner_dim), dtype=jnp.float32) \
        * (1.0 / (3 * input_dim) ** 0.5)
    b1 = jax.random.normal(k_b1, (inner_dim,), dtype=jnp.float32) * 0.01
    w2 = jax.random.normal(k_w2, (inner_dim, num_classes), dtype=jnp.float32) \
        * (1.0 / inner_dim ** 0.5)
    b2 = jax.random.normal(k_b2, (num_classes,), dtype=jnp.float32) * 0.01

    # Parameters are padded / cast ONCE (as they would be at model-load time).
    params = prepare_triplet_head_params(w1, b1, w2, b2, compute_dtype=jnp.bfloat16)

    out = bart_triplet_head(head, tail, ctxt, params, batch_tile=16)
    out = jax.block_until_ready(out)
    assert out.shape == (B, num_classes)

    # Reference with the same bf16 rounding of inputs / weights (f32 math),
    # so the check isolates kernel correctness from quantization error.
    bf = lambda a: a.astype(jnp.bfloat16).astype(jnp.float32)
    ref_q = _reference(bf(head), bf(tail), bf(ctxt), bf(w1), b1, bf(w2), b2)
    assert jnp.allclose(out, ref_q, atol=2e-2, rtol=2e-2), \
        float(jnp.max(jnp.abs(out - ref_q)))

    # Loose sanity check against the pure-f32 module semantics.
    ref = _reference(head, tail, ctxt, w1, b1, w2, b2)
    assert jnp.allclose(out, ref, atol=1e-1, rtol=1e-1)

    print("KERNEL_OK")
</pallas_src>

<mosaic_0001>
module attributes {stable_mosaic.version = 11 : i64} {
  func.func @_triplet_head_kernel(%arg0: i32, %arg1: memref<16x32xbf16, #tpu.memory_space<vmem>>, %arg2: memref<16x32xbf16, #tpu.memory_space<vmem>>, %arg3: memref<16x32xbf16, #tpu.memory_space<vmem>>, %arg4: memref<3x32x128xbf16, #tpu.memory_space<vmem>>, %arg5: memref<1x128xf32, #tpu.memory_space<vmem>>, %arg6: memref<128x128xbf16, #tpu.memory_space<vmem>>, %arg7: memref<1x128xf32, #tpu.memory_space<vmem>>, %arg8: memref<16x128xf32, #tpu.memory_space<vmem>>) attributes {dimension_semantics = [#tpu.dimension_semantics<parallel>], iteration_bounds = array<i64: 2>, scalar_prefetch = 0 : i64, scratch_operands = 0 : i64, tpu.core_type = #tpu.core_type<tc>, window_params = [{transform_indices = @transform_0, window_bounds = array<i64: 16, 32>}, {transform_indices = @transform_1, window_bounds = array<i64: 16, 32>}, {transform_indices = @transform_2, window_bounds = array<i64: 16, 32>}, {pipeline_mode = #tpu.pipeline_mode<synchronous>, transform_indices = @transform_3, window_bounds = array<i64: 3, 32, 128>}, {pipeline_mode = #tpu.pipeline_mode<synchronous>, transform_indices = @transform_4, window_bounds = array<i64: 1, 128>}, {pipeline_mode = #tpu.pipeline_mode<synchronous>, transform_indices = @transform_5, window_bounds = array<i64: 128, 128>}, {pipeline_mode = #tpu.pipeline_mode<synchronous>, transform_indices = @transform_6, window_bounds = array<i64: 1, 128>}, {transform_indices = @transform_7, window_bounds = array<i64: 16, 128>}]} {
    %c0 = arith.constant 0 : index
    %c0_0 = arith.constant 0 : index
    %0 = vector.load %arg1[%c0, %c0_0] : memref<16x32xbf16, #tpu.memory_space<vmem>>, vector<16x32xbf16>
    %c0_1 = arith.constant 0 : index
    %c0_2 = arith.constant 0 : index
    %c0_3 = arith.constant 0 : index
    %1 = vector.load %arg4[%c0_1, %c0_2, %c0_3] : memref<3x32x128xbf16, #tpu.memory_space<vmem>>, vector<1x32x128xbf16>
    %2 = vector.shape_cast %1 : vector<1x32x128xbf16> to vector<32x128xbf16>
    %cst = arith.constant dense<0.000000e+00> : vector<16x128xf32>
    %3 = tpu.matmul %0, %2, %cst {dimension_numbers = #tpu.dot_dimension_numbers<[1], [0], [0], [1], [0, 0, 1, 1], [], []>} : vector<16x32xbf16>, vector<32x128xbf16>, vector<16x128xf32> -> vector<16x128xf32>
    %c0_4 = arith.constant 0 : index
    %c0_5 = arith.constant 0 : index
    %4 = vector.load %arg2[%c0_4, %c0_5] : memref<16x32xbf16, #tpu.memory_space<vmem>>, vector<16x32xbf16>
    %c1 = arith.constant 1 : index
    %c0_6 = arith.constant 0 : index
    %c0_7 = arith.constant 0 : index
    %5 = vector.load %arg4[%c1, %c0_6, %c0_7] : memref<3x32x128xbf16, #tpu.memory_space<vmem>>, vector<1x32x128xbf16>
    %6 = vector.shape_cast %5 : vector<1x32x128xbf16> to vector<32x128xbf16>
    %cst_8 = arith.constant dense<0.000000e+00> : vector<16x128xf32>
    %7 = tpu.matmul %4, %6, %cst_8 {dimension_numbers = #tpu.dot_dimension_numbers<[1], [0], [0], [1], [0, 0, 1, 1], [], []>} : vector<16x32xbf16>, vector<32x128xbf16>, vector<16x128xf32> -> vector<16x128xf32>
    %8 = arith.addf %3, %7 : vector<16x128xf32>
    %c0_9 = arith.constant 0 : index
    %c0_10 = arith.constant 0 : index
    %9 = vector.load %arg3[%c0_9, %c0_10] : memref<16x32xbf16, #tpu.memory_space<vmem>>, vector<16x32xbf16>
    %c2 = arith.constant 2 : index
    %c0_11 = arith.constant 0 : index
    %c0_12 = arith.constant 0 : index
    %10 = vector.load %arg4[%c2, %c0_11, %c0_12] : memref<3x32x128xbf16, #tpu.memory_space<vmem>>, vector<1x32x128xbf16>
    %11 = vector.shape_cast %10 : vector<1x32x128xbf16> to vector<32x128xbf16>
    %cst_13 = arith.constant dense<0.000000e+00> : vector<16x128xf32>
    %12 = tpu.matmul %9, %11, %cst_13 {dimension_numbers = #tpu.dot_dimension_numbers<[1], [0], [0], [1], [0, 0, 1, 1], [], []>} : vector<16x32xbf16>, vector<32x128xbf16>, vector<16x128xf32> -> vector<16x128xf32>
    %13 = arith.addf %8, %12 : vector<16x128xf32>
    %c0_14 = arith.constant 0 : index
    %c0_15 = arith.constant 0 : index
    %14 = vector.load %arg5[%c0_14, %c0_15] : memref<1x128xf32, #tpu.memory_space<vmem>>, vector<1x128xf32>
    %15 = vector.broadcast %14 : vector<1x128xf32> to vector<16x128xf32>
    %16 = arith.addf %13, %15 : vector<16x128xf32>
    %17 = math.tanh %16 : vector<16x128xf32>
    %18 = arith.truncf %17 : vector<16x128xf32> to vector<16x128xbf16>
    %c0_16 = arith.constant 0 : index
    %c0_17 = arith.constant 0 : index
    %19 = vector.load %arg6[%c0_16, %c0_17] : memref<128x128xbf16, #tpu.memory_space<vmem>>, vector<128x128xbf16>
    %cst_18 = arith.constant dense<0.000000e+00> : vector<16x128xf32>
    %20 = tpu.matmul %18, %19, %cst_18 {dimension_numbers = #tpu.dot_dimension_numbers<[1], [0], [0], [1], [0, 0, 1, 1], [], []>} : vector<16x128xbf16>, vector<128x128xbf16>, vector<16x128xf32> -> vector<16x128xf32>
    %c0_19 = arith.constant 0 : index
    %c0_20 = arith.constant 0 : index
    %21 = vector.load %arg7[%c0_19, %c0_20] : memref<1x128xf32, #tpu.memory_space<vmem>>, vector<1x128xf32>
    %22 = vector.broadcast %21 : vector<1x128xf32> to vector<16x128xf32>
    %23 = arith.addf %20, %22 : vector<16x128xf32>
    %c0_21 = arith.constant 0 : index
    %c0_22 = arith.constant 0 : index
    %24 = vector.load %arg8[%c0_21, %c0_22] : memref<16x128xf32, #tpu.memory_space<vmem>>, vector<16x128xf32>
    tpu.vector_store %arg8[%c0_21, %c0_22], %23 {strides = array<i32>} : memref<16x128xf32, #tpu.memory_space<vmem>>, vector<16x128xf32>,
    return
  }
  func.func @transform_0(%arg0: i32) -> (i32, i32) {
    %c0_i32 = arith.constant 0 : i32
    %c0_i32_0 = arith.constant 0 : i32
    return %arg0, %c0_i32 : i32, i32
  }
  func.func @transform_1(%arg0: i32) -> (i32, i32) {
    %c0_i32 = arith.constant 0 : i32
    %c0_i32_0 = arith.constant 0 : i32
    return %arg0, %c0_i32 : i32, i32
  }
  func.func @transform_2(%arg0: i32) -> (i32, i32) {
    %c0_i32 = arith.constant 0 : i32
    %c0_i32_0 = arith.constant 0 : i32
    return %arg0, %c0_i32 : i32, i32
  }
  func.func @transform_3(%arg0: i32) -> (i32, i32, i32) {
    %c0_i32 = arith.constant 0 : i32
    %c0_i32_0 = arith.constant 0 : i32
    %c0_i32_1 = arith.constant 0 : i32
    %c0_i32_2 = arith.constant 0 : i32
    return %c0_i32, %c0_i32_0, %c0_i32_1 : i32, i32, i32
  }
  func.func @transform_4(%arg0: i32) -> (i32, i32) {
    %c0_i32 = arith.constant 0 : i32
    %c0_i32_0 = arith.constant 0 : i32
    %c0_i32_1 = arith.constant 0 : i32
    return %c0_i32, %c0_i32_0 : i32, i32
  }
  func.func @transform_5(%arg0: i32) -> (i32, i32) {
    %c0_i32 = arith.constant 0 : i32
    %c0_i32_0 = arith.constant 0 : i32
    %c0_i32_1 = arith.constant 0 : i32
    return %c0_i32, %c0_i32_0 : i32, i32
  }
  func.func @transform_6(%arg0: i32) -> (i32, i32) {
    %c0_i32 = arith.constant 0 : i32
    %c0_i32_0 = arith.constant 0 : i32
    %c0_i32_1 = arith.constant 0 : i32
    return %c0_i32, %c0_i32_0 : i32, i32
  }
  func.func @transform_7(%arg0: i32) -> (i32, i32) {
    %c0_i32 = arith.constant 0 : i32
    %c0_i32_0 = arith.constant 0 : i32
    return %arg0, %c0_i32 : i32, i32
  }
}

</mosaic_0001>

<bundles_post_ra>
// kernel: tpu_custom_call.1
= control target key start
LH: loop header
LB: loop body
LE: loop exit
PB: predicated region body
PF: predicated region fallthrough
CT: control target
= control target key end

     0   :  { %s1678_s0 = inlined_call_operand.hbm [shape: bf16[32,32], index: 0, kind: input, shape index: {}]   ;;  %s1679_s1 = inlined_call_operand.hbm [shape: bf16[32,32], index: 1, kind: input, shape index: {}]   ;;  %s1680_s2 = inlined_call_operand.hbm [shape: bf16[32,32], index: 2, kind: input, shape index: {}]   ;;  %s1681_s3 = inlined_call_operand.hbm [shape: bf16[3,32,128], index: 3, kind: input, shape index: {}]   ;;  %s1682_s4 = inlined_call_operand.vmem [shape: f32[1,128], index: 4, kind: input, shape index: {}]   ;;  %s1683_s5 = inlined_call_operand.hbm [shape: bf16[128,128], index: 5, kind: input, shape index: {}]   ;;  %s1684_s6 = inlined_call_operand.vmem [shape: f32[1,128], index: 6, kind: input, shape index: {}]   ;;  %s1685_s7 = inlined_call_operand.hbm [shape: f32[32,128], index: 7, kind: output, shape index: {}]  }
   0x1   :  { %1701 = sst [smem:[#allocation19_spill]] %s1679_s1 }
   0x2   :  { %1702 = sst [smem:[#allocation20_spill]] %s1681_s3 }
   0x3   :  { %1703 = sst [smem:[#allocation21_spill]] %s1683_s5 }
   0x4   :  { %12 = vsyncpa [#allocation3], 0 }
   0x5   :  { %14 = vsyncpa [#allocation3 + $0x1], 0 }
   0x6   :  { %15 = vsyncpa [#allocation6], 0 }
   0x7   :  { %17 = vsyncpa [#allocation6 + $0x1], 0 }
   0x8   :  { %18 = vsyncpa [#allocation9], 0 }
   0x9   :  { %19 = vsyncpa [#allocation4], 0 }
   0xa   :  { %21 = vsyncpa [#allocation4 + $0x1], 0  ;;  %s1369_s24 = smov 0   ;;  %s1371_s25 = smov 0  }
   0xb   :  { %s1373_s26 = smov 0   ;;  %s1375_s27 = smov 0  }
   0xc LB: > { %1704 = sst [smem:[#allocation16_spill]] %s1315_s27  ;;  %s1390_s28 = sadd.s32 4294967295, %s1315_s27   ;;  %s1315_s27 = sphi %s1375_s27, %s1731_s27   ;;  %s1311_s26 = sphi %s1373_s26, %s1735_s26   ;;  %s1307_s25 = sphi %s1371_s25, %s1734_s25   ;;  %s1303_s24 = sphi %s1369_s24, %s1733_s24  }
   0xd   : > { %s889_s29 = sadd.s32 4294967294, %s1315_s27   ;;  %s1394_s30 = sadd.s32 1, %s1315_s27  }
   0xe   : > { %1705 = sst [smem:[#allocation17_spill]] %s1394_s30  ;;  %s34_s8 = sadd.s32 1, %s1311_s26 }
   0xf   : > { %s31_s9 = ssub.s32 %s1315_s27, %s1394_s30  ;;  %p41_p0 = scmp.ne.s32.totalorder %s1311_s26, %s1307_s25 }
  0x10   : > { %p32_p1 = scmp.eq.s32.totalorder %s31_s9, 0  ;;  %p42_p2 = scmp.eq.s32.totalorder %s1315_s27, 0 }
  0x11   : > { %p47_p3 = scmp.ne.s32.totalorder %s1307_s25, %s1303_s24  ;;  %p1686_p4 = scmp.eq.s32.totalorder %s1390_s28, 0 }
  0x12   : > { %s1406_s10 = scalar_select %p32_p1, %s1311_s26, %s34_s8  }
  0x13   : > { %p1408_p5 = por %p42_p2, %p41_p0  ;;  %p1414_p6 = por %p1686_p4, %p47_p3 }
  0x14   : > { %1706 = sst [smem:[#allocation18_spill]] %s1406_s10  ;;  %p207_p7 = scmp.eq.s32.totalorder %s1390_s28, 1 }
  0x15   : > { %s1708_s12 = scalar_select %p1414_p6, 1, 0 }
  0x16   : > { %p213_p8 = scmp.eq.s32.totalorder %s889_s29, 1  ;;  %p890_p9 = scmp.ge.s32.totalorder %s1315_s27, 1 }
  0x17   : > { %p220_p10 = scmp.lt.s32.totalorder %s1315_s27, 3  ;;  %p1421_p11 = por %p207_p7, %p41_p0 }
  0x18   : > { %p1425_p12 = por %p213_p8, %p47_p3  ;;  %s1317_s16 = smov [#allocation8]  }
  0x19   : > { %s1709_s13 = scalar_select %p1421_p11, 1, 0 }
  0x1a   : > { %s1710_s14 = scalar_select %p1425_p12, 1, 0 }
  0x1b   : > { %p1429_p13 = pnand %p890_p9, %p220_p10  ;;  %s232_s17 = sshll.u32 %s1317_s16, 4  ;;  %s233_s17 = int_to_ptr.vmem [resolvable:$true] %s232_s17 }
  0x1c   : > { %p1042_p3 = scmp.lt.s32.totalorder %s1315_s27, 2  ;;  %s1688_s19 = sand.u32 1, %s1311_s26  }
  0x1d   : > { %s1711_s15 = scalar_select %p1429_p13, 1, 0 }
  0x1e   : > { %p1019_p1 = pneg %p1429_p13  ;;  %s1446_s20 = sshll.u32 %s1688_s19, 3 }
  0x1f   : > { %s1118_s21 = scalar_lea.vmem %s233_s17, 768 }
  0x20   : > { %p1437_p2 = pnand %p1019_p1, %p1686_p4  ;;  %p1119_p8 = scmp.ne.s32.totalorder %s233_s17, %s1118_s21 }
  0x21   : > { %p1126_p1 = scmp.lt.s32.totalorder %s233_s17, %s233_s17  ;;  %p1127_p4 = scmp.lt.s32.totalorder %s1118_s21, %s1118_s21 }
  0x22   : > { %s1712_s18 = scalar_select %p1437_p2, 1, 0 }
  0x23   : > { %p1696_p7 = pneg %p1437_p2  ;;  %p1128_p12 = por %p1127_p4, %p1126_p1 }
  0x25   : > { %p1121_p9 = pnand %p1119_p8, %p1696_p7 }
  0x27   : > { %p1122_p10 = pneg %p1121_p9 }
  0x29   : > { %p1129_p11 = pnand %p1128_p12, %p1122_p10 }
  0x2b   : > { %1132 = shalt.err (!%p1129_p11)
}
  0x2c   : > { %s1691_s22 = smov 64   ;;  %s1693_s23 = smov 4  }
  0x2d   : > { %s1713_s3 = sld [smem:[#allocation20_spill]]  ;;  %s1462_s9 = sshll.u32 %s1315_s27, 7 }
  0x2e   : > { %p1468_p4 = pnand %p1042_p3, %p1408_p5  ;;  %s286_s21 = sand.u32 1, %s1315_s27  }
  0x2f   : > { %s1715_s1 = sld [smem:[#allocation19_spill]]  ;;  %s1482_s11 = scalar_lea.sflag [#allocation6], %s286_s21 }
  0x30   : > { %p1488_p11 = pneg %p1468_p4 }
  0x33   : > { %1022 = dma.hbm_to_vmem [thread:$0]  (!%p1437_p2), %s1713_s3, 768, %s233_s17, [#allocation9], %s1691_s22, %s1691_s22, %s1693_s23  }
  0x34   : > { %s290_s17 = scalar_lea.vmem [#allocation5], %s1446_s20 }
  0x35   : > { %s1477_s30 = scalar_lea.hbm %s1715_s1, %s1462_s9  ;;  %s297_s29 = sshll.u32 %s290_s17, 4  ;;  %s1480_s29 = int_to_ptr.vmem [resolvable:$true] %s297_s29 }
  0x36   : > { %s1133_s8 = scalar_lea.hbm %s1477_s30, 128  ;;  %s1138_s23 = scalar_lea.hbm %s1715_s1, 256 }
  0x37   : > { %p1134_p5 = scmp.ne.s32.totalorder %s1477_s30, %s1133_s8  ;;  %p1139_p8 = scmp.lt.s32.totalorder %s1477_s30, %s1715_s1 }
  0x38   : > { %p1140_p9 = scmp.lt.s32.totalorder %s1138_s23, %s1133_s8 }
  0x39   : > { %p1136_p12 = pnand %p1488_p11, %p1134_p5 }
  0x3a   : > { %p1141_p10 = por %p1140_p9, %p1139_p8 }
  0x3b   : > { %p1137_p3 = pneg %p1136_p12 }
  0x3d   : > { %p1142_p1 = pnand %p1141_p10, %p1137_p3 }
  0x3f   : > { %1145 = shalt.err (!%p1142_p1)
}
  0x40   : > { %s1146_s21 = scalar_lea.vmem %s1480_s29, 128  ;;  %s1320_s27 = smov [#allocation5]  }
  0x41   : > { %p1147_p0 = scmp.ne.s32.totalorder %s1480_s29, %s1146_s21  ;;  %s1151_s10 = sshll.u32 %s1320_s27, 4  ;;  %s1152_s10 = int_to_ptr.vmem [resolvable:$false] %s1151_s10 }
  0x42   : > { %s1153_s19 = scalar_lea.vmem %s1152_s10, 256  ;;  %p1154_p7 = scmp.lt.s32.totalorder %s1480_s29, %s1152_s10 }
  0x43   : > { %p1149_p5 = pnand %p1147_p0, %p1488_p11  ;;  %p1155_p6 = scmp.lt.s32.totalorder %s1153_s19, %s1146_s21 }
  0x45   : > { %p1150_p12 = pneg %p1149_p5  ;;  %p1156_p13 = por %p1155_p6, %p1154_p7 }
  0x47   : > { %p1157_p2 = pnand %p1156_p13, %p1150_p12 }
  0x49   : > { %1160 = shalt.err (!%p1157_p2)
}
  0x4a   : > { %s1717_s3 = smov 4   ;;  %s1718_s23 = smov 64  }
  0x4b   : > { %1032 = dma.hbm_to_vmem [thread:$0]  (!%p1468_p4), %s1477_s30, 128, %s1480_s29, %s1482_s11, %s1718_s23, %s1718_s23, %s1717_s3  }
  0x4c   : > { %s1321_s8 = smov [#allocation10]   ;;  %p1719_p3 = scmp.ne.s32.totalorder %s1712_s18, 0 }
  0x4d   : > { %s248_s17 = sshll.u32 %s1321_s8, 4  ;;  %s249_s17 = int_to_ptr.vmem [resolvable:$true] %s248_s17 }
  0x4e   : > { %s1172_s27 = scalar_lea.vmem %s249_s17, 1024  ;;  %p1720_p8 = pneg %p1719_p3 }
  0x4f   : > { %p1173_p0 = scmp.ne.s32.totalorder %s249_s17, %s1172_s27  ;;  %p1180_p2 = scmp.lt.s32.totalorder %s249_s17, %s249_s17 }
  0x50   : > { %p1181_p7 = scmp.lt.s32.totalorder %s1172_s27, %s1172_s27 }
  0x51   : > { %p1175_p6 = pnand %p1173_p0, %p1720_p8 }
  0x52   : > { %p1182_p9 = por %p1181_p7, %p1180_p2 }
  0x53   : > { %p1176_p13 = pneg %p1175_p6 }
  0x55   : > { %p1183_p10 = pnand %p1182_p9, %p1176_p13 }
  0x57   : > { %1186 = shalt.err (!%p1183_p10)
}
  0x58   : > { %s1721_s5 = sld [smem:[#allocation21_spill]]  ;;  %s1529_s19 = scalar_lea.hbm %s1678_s0, %s1462_s9 }
  0x59   : > { %s269_s18 = scalar_lea.vmem [#allocation2], %s1446_s20  ;;  %s1722_s27 = sand.u32 1, %s1311_s26  }
  0x5a   : > { %s276_s8 = sshll.u32 %s269_s18, 4  ;;  %s266_s1 = scalar_lea.sflag [#allocation3], %s1722_s27  ;;  %s1532_s8 = int_to_ptr.vmem [resolvable:$true] %s276_s8 }
  0x5b   : > { %s1187_s30 = scalar_lea.hbm %s1529_s19, 128  ;;  %s1192_s21 = scalar_lea.hbm %s1678_s0, 256 }
  0x5c   : > { %p1188_p1 = scmp.ne.s32.totalorder %s1529_s19, %s1187_s30  ;;  %p1193_p0 = scmp.lt.s32.totalorder %s1529_s19, %s1678_s0 }
  0x5e   : > { %1025 = dma.hbm_to_vmem [thread:$0]  (!%p1719_p3), %s1721_s5, 1024, %s249_s17, [#allocation9], %s1718_s23, %s1718_s23, %s1717_s3  }
  0x5f   : > { %p1190_p5 = pnand %p1188_p1, %p1488_p11  ;;  %p1194_p3 = scmp.lt.s32.totalorder %s1192_s21, %s1187_s30 }
  0x61   : > { %p1191_p12 = pneg %p1190_p5  ;;  %p1195_p8 = por %p1194_p3, %p1193_p0 }
  0x63   : > { %p1196_p6 = pnand %p1195_p8, %p1191_p12 }
  0x65   : > { %1199 = shalt.err (!%p1196_p6)
}
  0x66   : > { %s1200_s18 = scalar_lea.vmem %s1532_s8, 128  ;;  %s1322_s27 = smov [#allocation2]  }
  0x67   : > { %p1201_p13 = scmp.ne.s32.totalorder %s1532_s8, %s1200_s18  ;;  %s1205_s17 = sshll.u32 %s1322_s27, 4  ;;  %s1206_s17 = int_to_ptr.vmem [resolvable:$false] %s1205_s17 }
  0x68   : > { %s1207_s29 = scalar_lea.vmem %s1206_s17, 256  ;;  %p1208_p9 = scmp.lt.s32.totalorder %s1532_s8, %s1206_s17 }
  0x69   : > { %p1203_p2 = pnand %p1201_p13, %p1488_p11  ;;  %p1209_p10 = scmp.lt.s32.totalorder %s1207_s29, %s1200_s18 }
  0x6b   : > { %p1204_p7 = pneg %p1203_p2  ;;  %p1210_p1 = por %p1209_p10, %p1208_p9 }
  0x6d   : > { %p1211_p5 = pnand %p1210_p1, %p1204_p7 }
  0x6f   : > { %1214 = shalt.err (!%p1211_p5)
}
  0x70   : > { %1029 = dma.hbm_to_vmem [thread:$0]  (!%p1468_p4), %s1529_s19, 128, %s1532_s8, %s266_s1, %s1718_s23, %s1718_s23, %s1717_s3  }
  0x71   : > { %s1563_s21 = scalar_lea.hbm %s1680_s2, %s1462_s9  ;;  %s311_s10 = scalar_lea.vmem [#allocation7], %s1446_s20 }
  0x72   : > { %s318_s18 = sshll.u32 %s311_s10, 4  ;;  %s1215_s27 = scalar_lea.hbm %s1563_s21, 128  ;;  %s319_s18 = int_to_ptr.vmem [resolvable:$true] %s318_s18 }
  0x73   : > { %p1216_p12 = scmp.ne.s32.totalorder %s1563_s21, %s1215_s27  ;;  %s1220_s1 = scalar_lea.hbm %s1680_s2, 256 }
  0x74   : > { %p1221_p8 = scmp.lt.s32.totalorder %s1563_s21, %s1680_s2  ;;  %p1222_p6 = scmp.lt.s32.totalorder %s1220_s1, %s1215_s27 }
  0x75   : > { %p1218_p0 = pnand %p1216_p12, %p1488_p11 }
  0x76   : > { %p1223_p13 = por %p1222_p6, %p1221_p8 }
  0x77   : > { %p1219_p3 = pneg %p1218_p0 }
  0x79   : > { %p1224_p2 = pnand %p1223_p13, %p1219_p3 }
  0x7b   : > { %1227 = shalt.err (!%p1224_p2)
}
  0x7c   : > { %s1228_s20 = scalar_lea.vmem %s319_s18, 128  ;;  %s1323_s9 = smov [#allocation7]  }
  0x7d   : > { %p1229_p7 = scmp.ne.s32.totalorder %s319_s18, %s1228_s20  ;;  %s1233_s5 = sshll.u32 %s1323_s9, 4  ;;  %s1234_s5 = int_to_ptr.vmem [resolvable:$false] %s1233_s5 }
  0x7e   : > { %s1235_s30 = scalar_lea.vmem %s1234_s5, 256  ;;  %p1236_p1 = scmp.lt.s32.totalorder %s319_s18, %s1234_s5 }
  0x7f   : > { %p1231_p9 = pnand %p1229_p7, %p1488_p11  ;;  %p1237_p5 = scmp.lt.s32.totalorder %s1235_s30, %s1228_s20 }
  0x81   : > { %p1232_p10 = pneg %p1231_p9  ;;  %p1238_p12 = por %p1237_p5, %p1236_p1 }
  0x83   : > { %p1239_p0 = pnand %p1238_p12, %p1232_p10 }
  0x85   : > { %1242 = shalt.err (!%p1239_p0)
}
  0x86   : > { %1035 = dma.hbm_to_vmem [thread:$0]  (!%p1468_p4), %s1563_s21, 128, %s319_s18, %s1482_s11, %s1718_s23, %s1718_s23, %s1717_s3  }
  0x87   : > { %p1723_p11 = scmp.ne.s32.totalorder %s1711_s15, 0 }
  0x88   : > { %s1589_s22 = sand.u32 (!%p1723_p11), 1, %s1307_s25   ;;  %p1724_p3 = scmp.ne.s32.totalorder (!%p1723_p11), %s1708_s12, 0 }
  0x89   : > { %330 = sbr.rel (%p1723_p11) target bundleno = 605 (0x25d), region = 48  ;;  %s1592_s10 = sshll.u32 (!%p1723_p11), %s1589_s22, 3 }
  0x8a   : > { %s333_s27 = scalar_lea.sflag (!%p1723_p11), [#allocation3], %s1589_s22  ;;  %s336_s16 = scalar_lea.vmem (!%p1723_p11), [#allocation2], %s1592_s10 }
  0x8e   : > { %1286 = dma.done.wait (%p1724_p3), %s333_s27, 128  }
  0x8f   : > { %1288 = vsyncadd (%p1724_p3), %s333_s27, 4294967168  ;;  %s341_s15 = sand.u32 1, %s1390_s28   ;;  %s345_s3 = scalar_lea.vmem [#allocation5], %s1592_s10 }
  0x90   : > { %s342_s11 = scalar_lea.sflag [#allocation6], %s341_s15 }
  0x91   : > { %1290 = dma.done.wait (%p1724_p3), %s342_s11, 256  }
  0x92   : > { %1292 = vsyncadd (%p1724_p3), %s342_s11, 4294967040  ;;  %s354_s23 = scalar_lea.vmem [#allocation7], %s1592_s10  ;;  %p1725_p4 = scmp.eq.s32.totalorder %s1390_s28, 0 }
  0x94   : > { %1294 = dma.done.wait (%p1725_p4), [#allocation9], 1792   ;;  %p1726_p8 = pmov %p1725_p4 }
  0x95   : > { %v1324_v0 = vmov 0.0   ;;  %vm1325_vm0 = vmmov 0   ;;  %v1086_v1 = vld [vmem:[#allocation8 + $0x18] sm:$0xff]   ;;  %v1087_v2 = vld [vmem:[#allocation8 + $0x10] sm:$0xff]   ;;  %v1088_v3 = vld [vmem:[%s345_s3] sm:$0xff]   ;;  %vm438_vm1 = vcmask 261120  }
  0x96   : > { %1296 = vsyncadd (%p1726_p8), [#allocation9], 4294965504  ;;  %959 = vmatprep.subr.bf16.mxu0 %v1324_v0  ;;  %963 = vmatprep.mubr.msk.bf16.mxu0 %vm1325_vm0, %v1324_v0  ;;  %v1089_v4 = vld [vmem:[#allocation8 + $0x8] sm:$0xff]   ;;  %v1090_v5 = vld [vmem:[#allocation8] sm:$0xff]   ;;  %s909_s18 = sshll.u32 %s1589_s22, 4  ;;  %s940_s8 = sshll.u32 %s1390_s28, 8 }
  0x97   : > { %983 = vmatprep.subr.bf16.mxu1 %v1324_v0  ;;  %999 = vmatprep.mubr.msk.bf16.mxu1 %vm1325_vm0, %v1324_v0  ;;  %v1091_v6 = vld [vmem:[%s336_s16] sm:$0xff]   ;;  %v1092_v7 = vld [vmem:[#allocation8 + $0x28] sm:$0xff]   ;;  %v1093_v8 = vld [vmem:[#allocation8 + $0x20] sm:$0xff]   ;;  %s402_s1 = scalar_lea.vmem [#allocation11], %s909_s18  ;;  %s1635_s5 = scalar_lea.hbm %s1685_s7, %s940_s8 }
  0x98   : > { %960 = vmatpush3.bf16.msra.mxu0 %v1086_v1  ;;  %v1094_v9 = vld [vmem:[%s354_s23] sm:$0xff]   ;;  %v1095_v10 = vld [vmem:[#allocation10 + $0x38] sm:$0xff]   ;;  %v1096_v11 = vld [vmem:[#allocation10 + $0x30] sm:$0xff]   ;;  %s754_s19 = sshll.u32 %s402_s1, 4  ;;  %s741_s30 = scalar_lea.sflag [#allocation4], %s1589_s22  ;;  %s1630_s19 = int_to_ptr.vmem [resolvable:$true] %s754_s19 }
  0x99   : > { %961 = vmatprep.subr.bf16.mxu0 %v1324_v0  ;;  %984 = vmatpush3.bf16.msra.mxu1 %v1095_v10  ;;  %v1097_v12 = vld [vmem:[#allocation10 + $0x28] sm:$0xff]   ;;  %v1098_v13 = vld [vmem:[#allocation10 + $0x20] sm:$0xff]   ;;  %v1099_v14 = vld [vmem:[#allocation10 + $0x18] sm:$0xff]   ;;  %s1243_s10 = scalar_lea.vmem %s1630_s19, 256  ;;  %p1727_p13 = scmp.ne.s32.totalorder %s1709_s13, 0 }
  0x9a   : > { %985 = vmatprep.subr.bf16.mxu1 %v1324_v0  ;;  %v1100_v15 = vld [vmem:[#allocation10 + $0x10] sm:$0xff]   ;;  %v1101_v16 = vld [vmem:[#allocation10 + $0x8] sm:$0xff]   ;;  %v1102_v17 = vld [vmem:[#allocation10] sm:$0xff]   ;;  %p1244_p6 = scmp.ne.s32.totalorder %s1630_s19, %s1243_s10  ;;  %s1326_s28 = smov [#allocation11]  }
  0x9b   : > { %v922_v29 = vld [vmem:[%s1682_s4] ss:$0 sm:$0xff]  ;;  %s1247_s27 = sshll.u32 %s1326_s28, 4  ;;  %s1248_s27 = int_to_ptr.vmem [resolvable:$false] %s1247_s27 }
  0x9c   : > { %962 = vmatpush3.bf16.msra.mxu0 %v1087_v2  ;;  %v923_v40 = vld [vmem:[%s1684_s6] ss:$0 sm:$0xff]  ;;  %p1245_p2 = pnand %p1244_p6, %p1727_p13  ;;  %s1249_s16 = scalar_lea.vmem %s1248_s27, 512 }
  0x9d   : > { %967 = vmatprep.subr.bf16.mxu0 %v1324_v0  ;;  %986 = vmatpush3.bf16.msra.mxu1 %v1096_v11  ;;  %p1250_p9 = scmp.lt.s32.totalorder %s1630_s19, %s1248_s27  ;;  %p1251_p10 = scmp.lt.s32.totalorder %s1249_s16, %s1243_s10 }
  0x9e   : > { %987 = vmatprep.subr.bf16.mxu1 %v1324_v0  ;;  %p1246_p7 = pneg %p1245_p2 }
  0x9f   : > { %964 = vmatmul.mubr.msk.bf16.vlgmr.msra.gmra.mxu0 %vm438_vm1, %v1088_v3  ;;  %p1252_p1 = por %p1251_p10, %p1250_p9 }
  0xa0   : > { %968 = vmatpush3.bf16.msra.mxu0 %v1089_v4  ;;  %971 = vmatprep.mubr.msk.bf16.mxu0 %vm1325_vm0, %v1324_v0 }
  0xa1   : > { %969 = vmatprep.subr.bf16.mxu0 %v1324_v0  ;;  %988 = vmatpush3.bf16.msra.mxu1 %v1097_v12  ;;  %p1253_p5 = pnand %p1252_p1, %p1246_p7 }
  0xa2   : > { %989 = vmatprep.subr.bf16.mxu1 %v1324_v0 }
  0xa4   : > { %970 = vmatpush3.bf16.msra.mxu0 %v1090_v5 }
  0xa5   : > { %975 = vmatprep.subr.bf16.mxu0 %v1324_v0  ;;  %990 = vmatpush3.bf16.msra.mxu1 %v1098_v13 }
  0xa6   : > { %991 = vmatprep.subr.bf16.mxu1 %v1324_v0 }
  0xa7   : > { %972 = vmatmul.mubr.msk.bf16.vlgmr.msra.gmra.mxu0 %vm438_vm1, %v1091_v6 }
  0xa8   : > { %976 = vmatpush3.bf16.msra.mxu0 %v1092_v7  ;;  %979 = vmatprep.mubr.msk.bf16.mxu0 %vm1325_vm0, %v1324_v0 }
  0xa9   : > { %977 = vmatprep.subr.bf16.mxu0 %v1324_v0  ;;  %992 = vmatpush3.bf16.msra.mxu1 %v1099_v14 }
  0xaa   : > { %993 = vmatprep.subr.bf16.mxu1 %v1324_v0 }
  0xac   : > { %978 = vmatpush3.bf16.msra.mxu0 %v1093_v8 }
  0xad   : > { %994 = vmatpush3.bf16.msra.mxu1 %v1100_v15 }
  0xae   : > { %995 = vmatprep.subr.bf16.mxu1 %v1324_v0 }
  0xaf   : > { %980 = vmatmul.mubr.msk.bf16.vlgmr.msra.gmra.mxu0 %vm438_vm1, %v1094_v9 }
  0xb1   : > { %996 = vmatpush3.bf16.msra.mxu1 %v1101_v16 }
  0xb2   : > { %997 = vmatprep.subr.bf16.mxu1 %v1324_v0 }
  0xb5   : > { %998 = vmatpush3.bf16.msra.mxu1 %v1102_v17 }
 0x15f   : > { %v476_v18 = vpop.f32.mrf.mxu0 }
 0x161   : > { %v965_v19 = vpop.f32.mrf.mxu0 }
 0x163   : > { %v479_v20 = vpop.f32.mrf.mxu0 }
 0x165   : > { %v966_v21 = vpop.f32.mrf.mxu0 }
 0x167   : > { %v537_v22 = vpop.f32.mrf.mxu0 }
 0x168   : > { %v538_v26 = vadd.f32 %v537_v22, %v476_v18 }
 0x169   : > { %v973_v23 = vpop.f32.mrf.mxu0 }
 0x16b   : > { %v540_v24 = vpop.f32.mrf.mxu0 }
 0x16c   : > { %v541_v31 = vadd.f32 %v540_v24, %v479_v20 }
 0x16d   : > { %v974_v25 = vpop.f32.mrf.mxu0 }
 0x16f   : > { %v605_v27 = vpop.f32.mrf.mxu0 }
 0x170   : > { %v612_v28 = vadd.f32 %v605_v27, %v538_v26 }
 0x171   : > { %v981_v30 = vpop.f32.mrf.mxu0 }
 0x172   : > { %v621_v32 = vadd.f32 %v922_v29, %v612_v28 }
 0x173   : > { %v608_v33 = vpop.f32.mrf.mxu0 }
 0x174   : > { %v613_v34 = vadd.f32 %v608_v33, %v541_v31  ;;  %1103 = vtanh.f32 %v621_v32 }
 0x175   : > { %v982_v35 = vpop.f32.mrf.mxu0 }
 0x176   : > { %v622_v36 = vadd.f32 %v922_v29, %v613_v34 }
 0x178   : > { %1105 = vtanh.f32 %v622_v36 }
 0x181   : > { %v1104_v37 = vpop.eup %1103 }
 0x185   : > { %v1106_v38 = vpop.eup %1105 }
 0x186   : > { %v625_v39 = vpack.c.bf16 %v1106_v38, %v1104_v37 }
 0x188   : > { %1000 = vmatmul.mubr.bf16.vlgmr.msra.gmra.mxu1 %v625_v39 }
 0x248   : > { %v731_v41 = vpop.f32.mrf.mxu1 }
 0x249   : > { %v732_v42 = vadd.f32 %v923_v40, %v731_v41 }
 0x24a   : > { %v1001_v43 = vpop.f32.mrf.mxu1 }
 0x24b   : > { %738 = vst [vmem:[%s402_s1] sm:$0xff] %v732_v42 }
 0x24c   : > { %v734_v44 = vpop.f32.mrf.mxu1 }
 0x24d   : > { %v735_v45 = vadd.f32 %v923_v40, %v734_v44 }
 0x24e   : > { %v1002_v46 = vpop.f32.mrf.mxu1 }
 0x24f   : > { %739 = vst [vmem:[%s402_s1 + $0x8] sm:$0xff] %v735_v45 }
 0x250   : > { %1256 = shalt.err (!%p1253_p5)
}
 0x251   : > { %s1257_s15 = scalar_lea.hbm %s1635_s5, 256  ;;  %s1261_s23 = scalar_lea.hbm %s1685_s7, 512 }
 0x252   : > { %p1258_p12 = scmp.ne.s32.totalorder %s1635_s5, %s1257_s15  ;;  %p1262_p3 = scmp.lt.s32.totalorder %s1635_s5, %s1685_s7 }
 0x253   : > { %p1263_p4 = scmp.lt.s32.totalorder %s1261_s23, %s1257_s15 }
 0x254   : > { %p1259_p0 = pnand %p1258_p12, %p1727_p13 }
 0x255   : > { %p1264_p8 = por %p1263_p4, %p1262_p3 }
 0x256   : > { %p1260_p11 = pneg %p1259_p0 }
 0x258   : > { %p1265_p6 = pnand %p1264_p8, %p1260_p11 }
 0x25a   : > { %1268 = shalt.err (!%p1265_p6)
}
 0x25b   : > { %s1327_s18 = smov 128   ;;  %s1328_s17 = smov 8  }
 0x25c   : > { %1017 = dma.vmem_to_hbm [thread:$0]  (%p1727_p13), %s1630_s19, 256, %s1635_s5, %s741_s30, %s1327_s18, %s1327_s18, %s1328_s17  }
 0x25d PF: > { %s1728_s29 = sld [smem:[#allocation16_spill]]  ;;  %s769_s1 = sand.u32 1, %s1303_s24  }
 0x25e   : > { %p1729_p2 = scmp.ne.s32.totalorder %s1710_s14, 0  ;;  %s770_s8 = scalar_lea.sflag [#allocation4], %s769_s1 }
 0x263   : > { %p1730_p7 = scmp.ge.s32.totalorder %s1728_s29, 2 }
 0x265   : > { %p1037_p9 = pnand %p1730_p7, %p1729_p2 }
 0x267   : > { %p1038_p10 = pneg %p1037_p9 }
 0x269   : > { %1298 = dma.done.wait (%p1038_p10), %s770_s8, 256  }
 0x26a   : > { %1300 = vsyncadd (%p1038_p10), %s770_s8, 4294967040  ;;  %s1731_s27 = sld [smem:[#allocation17_spill]]  ;;  %s1733_s24 = smov %s1307_s25 }
 0x26b   : > { %s1732_s20 = sld [smem:[#allocation18_spill]]  ;;  %s1734_s25 = smov %s1311_s26 }
 0x270   : > { %p24_p1 = scmp.ge.s32.totalorder %s1731_s27, 4  }
 0x271   : > { %s1735_s26 = smov %s1732_s20 }
 0x272   :  { %26 = sbr.rel (!%p24_p1) target bundleno = 12 (0xc), region = 127 }
 0x277   :  { %775 = vsyncpa [#allocation3], 1 }
 0x278   :  { %777 = vsyncpa [#allocation3 + $0x1], 1 }
 0x279   :  { %778 = vsyncpa [#allocation6], 1 }
 0x27a   :  { %780 = vsyncpa [#allocation6 + $0x1], 1 }
 0x27b   :  { %781 = vsyncpa [#allocation9], 1 }
 0x27c   :  { %782 = vsyncpa [#allocation4], 1 }
 0x27d   :  { %784 = vsyncpa [#allocation4 + $0x1], 1 }

</bundles_post_ra>
